<compile_context>
chip_gen: v7x
topology: tpu7x:2x2x1
jax: 0.10.0
libtpu: 0.0.40
codegen_flags: <defaults>
</compile_context>

<pallas_src>
import math
import jax
import jax.numpy as jnp
from jax.experimental import pallas as pl
from jax.experimental.pallas import tpu as pltpu


# ----------------------------------------------------------------------------
# Pallas kernel:
#   o[c, qw] = sum_{cl, fe} support[qw, cl, c, fe] * query[qw, cl, fe]
# Single un-gridded invocation; support stays in its original memory order.
# ----------------------------------------------------------------------------
def _ip_scores_kernel(s_ref, q_ref, o_ref):
    # s_ref: [QW, CL, C, FE]   (minor dims (C, FE) -> (sublane, lane))
    # q_ref: [QW, CL, 1, FE]   (size-1 class axis -> sublane broadcast)
    # o_ref: [C, QW]           (reference layout, written directly; no host .T)
    #
    # Keep this on the VPU (do NOT replace with jnp.dot): HBM-bound op,
    # an MXU matvec here would be <1% utilized.
    s = s_ref[...].astype(jnp.float32)       # f32 compute even for bf16 storage
    q = q_ref[...].astype(jnp.float32)
    prod = s * q                             # VPU; class axis broadcast 1 -> C
    part = jnp.sum(prod, axis=1)             # VPU add over CL: [QW, C, FE]
    res = jnp.sum(part, axis=-1)             # single XLU lane reduce: [QW, C]

    # In-kernel [QW, C] -> [C, QW] transpose via one-hot select + lane reduce
    # (VPU/XLU-only; avoids a separate host-side transpose op and avoids
    # depending on tpu.transpose lowering for a tiny unaligned tile).
    qw, c = res.shape
    rows = jax.lax.broadcasted_iota(jnp.int32, (c, qw, c), 0)
    cols = jax.lax.broadcasted_iota(jnp.int32, (c, qw, c), 2)
    picked = jnp.where(rows == cols, jnp.broadcast_to(res, (c, qw, c)), 0.0)
    o_ref[...] = jnp.sum(picked, axis=-1)    # [C, QW]


@jax.jit
def ip_scores_pallas(support, query):
    """support: [Q_num, W, CL, C, FE], query: [Q_num, W, CL, FE]
    -> ip_scores: [C, Q_num*W] float32."""
    Q_num, W, CL, C, FE = support.shape
    QW = Q_num * W

    # Free (metadata-only) reshapes: merge leading (Q_num, W) dims; add a
    # size-1 class axis to query.  No HBM copy of the big tensor (no permute),
    # no C-fold replication of the query in HBM.
    s = support.reshape(QW, CL, C, FE)
    q = query.reshape(QW, CL, 1, FE)

    # Demo-sized path: no grid, whole arrays resident in VMEM, one custom call.
    vmem = pl.BlockSpec(memory_space=pltpu.MemorySpace.VMEM)
    return pl.pallas_call(
        _ip_scores_kernel,
        out_shape=jax.ShapeDtypeStruct((C, QW), jnp.float32),
        in_specs=[vmem, vmem],
        out_specs=pl.BlockSpec(memory_space=pltpu.MemorySpace.VMEM),
    )(s, q)


# ----------------------------------------------------------------------------
# Parameter init (shapes from __init__).  These parameters are NEVER used by
# the reachable forward path (dead code after `return None`); they only mirror
# the module's __init__.  Weights use kaiming-normal (faithful to
# weights_init()); biases are zeros (PyTorch default bias init is uniform) —
# harmless since the params are unreachable.
# ----------------------------------------------------------------------------
def kaiming_normal(key, shape):
    fan_in = int(math.prod(shape[1:]))
    std = math.sqrt(2.0 / fan_in)
    return jax.random.normal(key, shape, dtype=jnp.float32) * std


def init_params(key, input_size, hidden_size, feature_dim):
    ks = jax.random.split(key, 8)
    fe = feature_dim
    return {
        # cw_layer
        "cw_conv1_w": kaiming_normal(ks[0], (5, 2, 3)),
        "cw_conv1_b": jnp.zeros((5,), jnp.float32),
        "cw_conv2_w": kaiming_normal(ks[1], (1, 5, 3)),
        "cw_conv2_b": jnp.zeros((1,), jnp.float32),
        "cw_fc1_w": kaiming_normal(ks[2], (fe // 2, fe)),
        "cw_fc1_b": jnp.zeros((fe // 2,), jnp.float32),
        "cw_fc2_w": kaiming_normal(ks[3], (1, fe // 2)),
        "cw_fc2_b": jnp.zeros((1,), jnp.float32),
        # ori_layer
        "ori_conv1_w": kaiming_normal(ks[4], (input_size, input_size * 2, 1)),
        "ori_conv1_b": jnp.zeros((input_size,), jnp.float32),
        "ori_conv2_w": kaiming_normal(ks[5], (input_size, input_size, 3)),
        "ori_conv2_b": jnp.zeros((input_size,), jnp.float32),
        # fcs
        "ori_fc1_w": kaiming_normal(ks[6], (hidden_size, 75)),
        "ori_fc1_b": jnp.zeros((hidden_size,), jnp.float32),
        "ori_fc2_w": kaiming_normal(ks[7], (1, hidden_size)),
        "ori_fc2_b": jnp.zeros((1,), jnp.float32),
    }


# ----------------------------------------------------------------------------
# Forward: mirrors the PyTorch forward exactly (compute ip_scores, print,
# return None).  Note: print() forces a device->host sync, as in the reference.
# ----------------------------------------------------------------------------
def forward(params, support, query):
    """support: [Q_num, W, CL, C, FE]; query: [Q_num, W, CL, FE] -> None."""
    ip_scores = ip_scores_pallas(support, query)   # [C, Q_num*W]
    print(ip_scores)
    return None
    # TODO(synk): cw_layer / ori_layer / fc / softmax code after `return None`
    # in the reference is unreachable dead code; not implemented.


if __name__ == "__main__":
    # Small shapes consistent with the module's forward signature.
    # QW = Q_num*W = 8 sublanes, CL*FE = 128 (one full f32 lane group).
    Q_num, W, CL, C, FE = 2, 4, 2, 3, 64
    input_size, hidden_size, main_fc_dim, feature_dim = CL, 32, 16, FE

    key = jax.random.PRNGKey(0)
    k_sup, k_qry, k_par = jax.random.split(key, 3)
    support = jax.random.normal(k_sup, (Q_num, W, CL, C, FE), dtype=jnp.float32)
    query = jax.random.normal(k_qry, (Q_num, W, CL, FE), dtype=jnp.float32)
    params = init_params(k_par, input_size, hidden_size, feature_dim)

    # Run the kernel once and block on it.
    ip_scores = jax.block_until_ready(ip_scores_pallas(support, query))

    # Pure-JAX reference (the reference's permute is used here only for checking).
    support_ip = jnp.transpose(support, (3, 0, 1, 2, 4)).reshape(C, Q_num * W, CL * FE)
    query_ip = query.reshape(Q_num * W, CL * FE)
    ref = jnp.einsum("ijk,jk->ij", support_ip, query_ip)
    assert ip_scores.shape == (C, Q_num * W)
    assert jnp.allclose(ip_scores, ref, atol=1e-4, rtol=1e-4), "mismatch vs reference"

    # bf16-storage path (halves HBM traffic on v6e/v7x; compute stays f32, so
    # it is also legal on v5e).  Loose tolerance: inputs are quantized.
    ip_bf16 = jax.block_until_ready(
        ip_scores_pallas(support.astype(jnp.bfloat16), query.astype(jnp.bfloat16)))
    assert jnp.allclose(ip_bf16, ref, atol=0.5, rtol=0.1), "bf16-storage mismatch"

    # Mirror the module's forward (prints ip_scores, returns None).
    result = forward(params, support, query)
    assert result is None

    print("KERNEL_OK")
</pallas_src>

<mosaic_0001>
module attributes {stable_mosaic.version = 11 : i64} {
  func.func @_ip_scores_kernel(%arg0: memref<8x2x3x64xf32, #tpu.memory_space<vmem>>, %arg1: memref<8x2x1x64xf32, #tpu.memory_space<vmem>>, %arg2: memref<3x8xf32, #tpu.memory_space<vmem>>) attributes {dimension_semantics = [], scalar_prefetch = 0 : i64, scratch_operands = 0 : i64, tpu.core_type = #tpu.core_type<tc>} {
    %c0 = arith.constant 0 : index
    %c0_0 = arith.constant 0 : index
    %c0_1 = arith.constant 0 : index
    %c0_2 = arith.constant 0 : index
    %0 = vector.load %arg0[%c0, %c0_0, %c0_1, %c0_2] : memref<8x2x3x64xf32, #tpu.memory_space<vmem>>, vector<8x2x3x64xf32>
    %c0_3 = arith.constant 0 : index
    %c0_4 = arith.constant 0 : index
    %c0_5 = arith.constant 0 : index
    %c0_6 = arith.constant 0 : index
    %1 = vector.load %arg1[%c0_3, %c0_4, %c0_5, %c0_6] : memref<8x2x1x64xf32, #tpu.memory_space<vmem>>, vector<8x2x1x64xf32>
    %2 = vector.broadcast %1 : vector<8x2x1x64xf32> to vector<8x2x3x64xf32>
    %3 = arith.mulf %0, %2 : vector<8x2x3x64xf32>
    %cst = arith.constant dense<0.000000e+00> : vector<8x3x64xf32>
    %4 = vector.multi_reduction <add>, %3, %cst [1] : vector<8x2x3x64xf32> to vector<8x3x64xf32>
    %cst_7 = arith.constant dense<0.000000e+00> : vector<8x3xf32>
    %5 = vector.multi_reduction <add>, %4, %cst_7 [2] : vector<8x3x64xf32> to vector<8x3xf32>
    %6 = tpu.iota {dimensions = array<i32: 0>} : vector<3x8x3xi32>
    %7 = tpu.iota {dimensions = array<i32: 2>} : vector<3x8x3xi32>
    %8 = arith.cmpi eq, %6, %7 : vector<3x8x3xi32>
    %9 = vector.shape_cast %5 : vector<8x3xf32> to vector<1x8x3xf32>
    %10 = vector.broadcast %9 : vector<1x8x3xf32> to vector<3x8x3xf32>
    %cst_8 = arith.constant 0.000000e+00 : f32
    %11 = vector.broadcast %cst_8 : f32 to vector<3x8x3xf32>
    %12 = arith.select %8, %10, %11 : vector<3x8x3xi1>, vector<3x8x3xf32>
    %cst_9 = arith.constant dense<0.000000e+00> : vector<3x8xf32>
    %13 = vector.multi_reduction <add>, %12, %cst_9 [2] : vector<3x8x3xf32> to vector<3x8xf32>
    %c0_10 = arith.constant 0 : index
    %c0_11 = arith.constant 0 : index
    %14 = vector.load %arg2[%c0_10, %c0_11] : memref<3x8xf32, #tpu.memory_space<vmem>>, vector<3x8xf32>
    tpu.vector_store %arg2[%c0_10, %c0_11], %13 {strides = array<i32>} : memref<3x8xf32, #tpu.memory_space<vmem>>, vector<3x8xf32>,
    return
  }
}

</mosaic_0001>

<bundles_post_ra>
// kernel: ip_scores_pallas.1
= control target key start
LH: loop header
LB: loop body
LE: loop exit
PB: predicated region body
PF: predicated region fallthrough
CT: control target
= control target key end

     0   :  { %vm156_vm0 = vcmask 518144   ;;  %s505_s0 = inlined_call_operand.vmem [shape: f32[8,2,3,64], index: 0, kind: input, shape index: {}]   ;;  %s506_s1 = inlined_call_operand.vmem [shape: f32[8,2,1,64], index: 1, kind: input, shape index: {}]   ;;  %s507_s2 = inlined_call_operand.hbm [shape: f32[3,8], index: 2, kind: output, shape index: {}]  }
   0x1   :  { %v12_v0 = vld [vmem:[%s505_s0] sm:$0x7]  ;;  %v13_v1 = vld [vmem:[%s505_s0 + $0x4] sm:$0x7]  ;;  %v16_v5 = vld [vmem:[%s505_s0 + $0x10] sm:$0x7] }
   0x2   :  { %v312_v2 = vld [vmem:[%s506_s1] ss:$0 sm:$0xff]  ;;  %v313_v3 = vld [vmem:[%s506_s1 + $0x1] ss:$0 sm:$0xff]  ;;  %v17_v7 = vld [vmem:[%s505_s0 + $0x14] sm:$0x7] }
   0x3   :  { %v140_v4 = vmul.f32 %v312_v2, %v12_v0  ;;  %v141_v6 = vmul.f32 %v313_v3, %v13_v1  ;;  %v316_v8 = vld [vmem:[%s506_s1 + $0x4] ss:$0 sm:$0xff]  ;;  %v317_v9 = vld [vmem:[%s506_s1 + $0x5] ss:$0 sm:$0xff]  ;;  %v14_v13 = vld [vmem:[%s505_s0 + $0x8] sm:$0x7] }
   0x4   :  { %v144_v11 = vmul.f32 %v316_v8, %v16_v5  ;;  %v145_v12 = vmul.f32 %v317_v9, %v17_v7  ;;  %v15_v14 = vld [vmem:[%s505_s0 + $0xc] sm:$0x7]  ;;  %v314_v16 = vld [vmem:[%s506_s1 + $0x2] ss:$0 sm:$0xff]  ;;  %v315_v17 = vld [vmem:[%s506_s1 + $0x3] ss:$0 sm:$0xff] }
   0x5   :  { %v157_v10 = vsel %vm156_vm0, %v140_v4, 0.0  ;;  %v158_v15 = vsel %vm156_vm0, %v141_v6, 0.0  ;;  %v142_v21 = vmul.f32 %v314_v16, %v14_v13  ;;  %v18_v22 = vld [vmem:[%s505_s0 + $0x18] sm:$0x7]  ;;  %v19_v23 = vld [vmem:[%s505_s0 + $0x1c] sm:$0x7]  ;;  %v143_v25 = vmul.f32 %v315_v17, %v15_v14 }
   0x6   :  { %v159_v18 = vadd.f32 %v158_v15, %v157_v10  ;;  %v163_v19 = vsel %vm156_vm0, %v144_v11, 0.0  ;;  %v164_v20 = vsel %vm156_vm0, %v145_v12, 0.0  ;;  %v318_v26 = vld [vmem:[%s506_s1 + $0x6] ss:$0 sm:$0xff]  ;;  %v319_v27 = vld [vmem:[%s506_s1 + $0x7] ss:$0 sm:$0xff] }
   0x7   :  { %v165_v24 = vadd.f32 %v164_v20, %v163_v19  ;;  %v20_v28 = vld [vmem:[%s505_s0 + $0x20] sm:$0x7]  ;;  %v160_v30 = vsel %vm156_vm0, %v142_v21, 0.0  ;;  %v146_v31 = vmul.f32 %v318_v26, %v18_v22  ;;  %v147_v32 = vmul.f32 %v319_v27, %v19_v23  ;;  %v21_v33 = vld [vmem:[%s505_s0 + $0x24] sm:$0x7] }
   0x8   :  { %v181_v29 = vsel %vm156_vm0, %v159_v18, 0.0  ;;  %v320_v34 = vld [vmem:[%s506_s1 + $0x8] ss:$0 sm:$0xff]  ;;  %v161_v36 = vsel %vm156_vm0, %v143_v25, 0.0  ;;  %v321_v37 = vld [vmem:[%s506_s1 + $0x9] ss:$0 sm:$0xff] }
   0x9   :  { %182 = vadd.xlane.f32.xlu0 %v181_v29  ;;  %v187_v35 = vsel %vm156_vm0, %v165_v24, 0.0  ;;  %v148_v38 = vmul.f32 %v320_v34, %v20_v28  ;;  %v22_v39 = vld [vmem:[%s505_s0 + $0x28] sm:$0x7]  ;;  %v162_v40 = vadd.f32 %v161_v36, %v160_v30  ;;  %v166_v41 = vsel %vm156_vm0, %v146_v31, 0.0  ;;  %v23_v44 = vld [vmem:[%s505_s0 + $0x2c] sm:$0x7] }
   0xa   :  { %188 = vadd.xlane.f32.xlu1 %v187_v35  ;;  %v167_v42 = vsel %vm156_vm0, %v147_v32, 0.0  ;;  %v149_v43 = vmul.f32 %v321_v37, %v21_v33  ;;  %v322_v45 = vld [vmem:[%s506_s1 + $0xa] ss:$0 sm:$0xff]  ;;  %v323_v48 = vld [vmem:[%s506_s1 + $0xb] ss:$0 sm:$0xff] }
   0xb   :  { %v168_v46 = vadd.f32 %v167_v42, %v166_v41  ;;  %v169_v47 = vsel %vm156_vm0, %v148_v38, 0.0  ;;  %v150_v49 = vmul.f32 %v322_v45, %v22_v39  ;;  %v24_v50 = vld [vmem:[%s505_s0 + $0x30] sm:$0x7]  ;;  %v184_v51 = vsel %vm156_vm0, %v162_v40, 0.0  ;;  %v25_v54 = vld [vmem:[%s505_s0 + $0x34] sm:$0x7] }
   0xc   :  { %v170_v52 = vsel %vm156_vm0, %v149_v43, 0.0  ;;  %v151_v53 = vmul.f32 %v323_v48, %v23_v44  ;;  %v324_v55 = vld [vmem:[%s506_s1 + $0xc] ss:$0 sm:$0xff]  ;;  %v325_v59 = vld [vmem:[%s506_s1 + $0xd] ss:$0 sm:$0xff] }
   0xd   :  { %185 = vadd.xlane.f32.xlu0 %v184_v51  ;;  %v190_v56 = vsel %vm156_vm0, %v168_v46, 0.0  ;;  %v171_v57 = vadd.f32 %v170_v52, %v169_v47  ;;  %v172_v58 = vsel %vm156_vm0, %v150_v49, 0.0  ;;  %v152_v60 = vmul.f32 %v324_v55, %v24_v50  ;;  %v26_v61 = vld [vmem:[%s505_s0 + $0x38] sm:$0x7]  ;;  %v27_v0 = vld [vmem:[%s505_s0 + $0x3c] sm:$0x7] }
   0xe   :  { %191 = vadd.xlane.f32.xlu1 %v190_v56  ;;  %v173_v62 = vsel %vm156_vm0, %v151_v53, 0.0  ;;  %v153_v63 = vmul.f32 %v325_v59, %v25_v54  ;;  %v326_v1 = vld [vmem:[%s506_s1 + $0xe] ss:$0 sm:$0xff]  ;;  %v327_v5 = vld [vmem:[%s506_s1 + $0xf] ss:$0 sm:$0xff] }
   0xf   :  { %v193_v2 = vsel %vm156_vm0, %v171_v57, 0.0  ;;  %v174_v3 = vadd.f32 %v173_v62, %v172_v58  ;;  %v175_v4 = vsel %vm156_vm0, %v152_v60, 0.0  ;;  %v154_v6 = vmul.f32 %v326_v1, %v26_v61 }
  0x10   :  { %7 = vsyncpa [#allocation3], 0  ;;  %v176_v7 = vsel %vm156_vm0, %v153_v63, 0.0  ;;  %v155_v8 = vmul.f32 %v327_v5, %v27_v0  ;;  %v205_v16 = vlaneseq  ;;  %vm250_vm1 = vcmask 1041409   ;;  %s353_s0 = smov [#allocation2]  }
  0x11   :  { %194 = vadd.xlane.f32.xlu0 %v193_v2  ;;  %v196_v9 = vsel %vm156_vm0, %v174_v3, 0.0  ;;  %v177_v10 = vadd.f32 %v176_v7, %v175_v4  ;;  %v178_v11 = vsel %vm156_vm0, %v154_v6, 0.0  ;;  %vm252_vm2 = vcmask 1042434   ;;  %s304_s1 = sshll.u32 %s353_s0, 4  ;;  %s305_s1 = int_to_ptr.vmem [resolvable:$true] %s304_s1 }
  0x12   :  { %197 = vadd.xlane.f32.xlu1 %v196_v9  ;;  %v179_v12 = vsel %vm156_vm0, %v155_v8, 0.0  ;;  %v206_v17 = vand.u32 127, %v205_v16  ;;  %v219_v18 = vshrl.u32 %v205_v16, 7  ;;  %vm254_vm3 = vcmask 1043459   ;;  %s329_s17 = scalar_lea.vmem %s305_s1, 64  ;;  %p334_p1 = scmp.lt.s32.totalorder %s305_s1, %s305_s1 }
  0x13   :  { %v199_v13 = vsel %vm156_vm0, %v177_v10, 0.0  ;;  %v180_v14 = vadd.f32 %v179_v12, %v178_v11  ;;  %vm256_vm4 = vcmask 1044484   ;;  %vm258_vm5 = vcmask 1045509   ;;  %p330_p0 = scmp.ne.s32.totalorder %s305_s1, %s329_s17  ;;  %p335_p2 = scmp.lt.s32.totalorder %s329_s17, %s329_s17 }
  0x14   :  { %v220_v20 = vsub.s32 %v206_v17, %v219_v18  ;;  %vm260_vm6 = vcmask 1046534   ;;  %vm262_vm7 = vcmask 1047559   ;;  %vm208_vm8 = vcmp.eq.s32.totalorder %v206_v17, 1 }
  0x15   :  { %200 = vadd.xlane.f32.xlu0 %v199_v13  ;;  %v202_v15 = vsel %vm156_vm0, %v180_v14, 0.0  ;;  %vm207_vm9 = vcmp.eq.s32.totalorder %v206_v17, 0  ;;  %vm268_vm10 = vcmask 23552   ;;  %vm209_vm11 = vcmp.eq.s32.totalorder %v206_v17, 2  ;;  %p336_p3 = por %p335_p2, %p334_p1 }
  0x16   :  { %203 = vadd.xlane.f32.xlu1 %v202_v15  ;;  %vm296_vm12 = vcmask 59392  }
  0x17   :  { %p337_p4 = pnand %p336_p3, %p330_p0 }
  0x96   :  { %v183_v19 = vpop.xlane.xlu0 %182 }
  0x97   :  { %v189_v21 = vpop.xlane.xlu1 %188  ;;  %v221_v23 = vrot.slane %v183_v19, %v220_v20 }
  0x98   :  { %v229_v26 = vrot.slane %v189_v21, %v220_v20 }
  0x9a   :  { %v186_v22 = vpop.xlane.xlu0 %185 }
  0x9b   :  { %v225_v24 = vrot.slane %v186_v22, %v220_v20  ;;  %v192_v25 = vpop.xlane.xlu1 %191 }
  0x9c   :  { %v233_v27 = vrot.slane %v192_v25, %v220_v20 }
  0x9d   :  { %v251_v28 = vsel %vm250_vm1, %v225_v24, %v221_v23 }
  0x9e   :  { %v253_v29 = vsel %vm252_vm2, %v229_v26, %v251_v28  ;;  %v195_v30 = vpop.xlane.xlu0 %194 }
  0x9f   :  { %v255_v31 = vsel %vm254_vm3, %v233_v27, %v253_v29  ;;  %v237_v32 = vrot.slane %v195_v30, %v220_v20  ;;  %v198_v33 = vpop.xlane.xlu1 %197 }
  0xa0   :  { %v241_v34 = vrot.slane %v198_v33, %v220_v20 }
  0xa1   :  { %v257_v35 = vsel %vm256_vm4, %v237_v32, %v255_v31 }
  0xa2   :  { %v201_v36 = vpop.xlane.xlu0 %200  ;;  %v259_v39 = vsel %vm258_vm5, %v241_v34, %v257_v35 }
  0xa3   :  { %v245_v37 = vrot.slane %v201_v36, %v220_v20  ;;  %v204_v38 = vpop.xlane.xlu1 %203 }
  0xa4   :  { %v249_v40 = vrot.slane %v204_v38, %v220_v20 }
  0xa5   :  { %v261_v41 = vsel %vm260_vm6, %v245_v37, %v259_v39 }
  0xa6   :  { %v263_v42 = vsel %vm262_vm7, %v249_v40, %v261_v41 }
  0xa7   :  { %v266_v43 = vsel %vm208_vm8, %v263_v42, 0.0  ;;  %v265_v44 = vsel %vm207_vm9, %v263_v42, 0.0  ;;  %v267_v47 = vsel %vm209_vm11, %v263_v42, 0.0 }
  0xa8   :  { %v272_v45 = vsel %vm268_vm10, %v266_v43, 0.0  ;;  %v269_v46 = vsel %vm268_vm10, %v265_v44, 0.0  ;;  %v275_v48 = vsel %vm268_vm10, %v267_v47, 0.0 }
  0xa9   :  { %273 = vadd.xlane.f32.xlu1 %v272_v45  ;;  %270 = vadd.xlane.f32.xlu0 %v269_v46 }
  0xad   :  { %276 = vadd.xlane.f32.xlu0 %v275_v48 }
 0x136   :  { %v274_v49 = vpop.xlane.xlu1 %273  ;;  %v271_v50 = vpop.xlane.xlu0 %270 }
 0x137   :  { %v288_v51 = vrot.slane %v274_v49, %v220_v20  ;;  %v284_v52 = vrot.slane %v271_v50, %v220_v20 }
 0x139   :  { %v293_v55 = vsel %vm250_vm1, %v288_v51, %v284_v52 }
 0x13a   :  { %v277_v53 = vpop.xlane.xlu0 %276 }
 0x13b   :  { %v292_v54 = vrot.slane %v277_v53, %v220_v20 }
 0x13d   :  { %v294_v56 = vsel %vm252_vm2, %v292_v54, %v293_v55 }
 0x13e   :  { %297 = vst.msk [vmem:[#allocation2] sm:$0x7] %vm296_vm12, %v294_v56 }
 0x13f   :  { %340 = shalt.err (!%p337_p4)
}
 0x140   :  { %s341_s20 = scalar_lea.hbm %s507_s2, 64 }
 0x141   :  { %p342_p5 = scmp.ne.s32.totalorder %s507_s2, %s341_s20  ;;  %p345_p6 = scmp.lt.u32.totalorder %s341_s20, %s507_s2 }
 0x143   :  { %p347_p7 = pnand %p345_p6, %p342_p5 }
 0x145   :  { %350 = shalt.err (!%p347_p7)
}
 0x146   :  { %307 = dma.vmem_to_hbm [thread:$0]  %s305_s1, 64, %s507_s2, [#allocation3]  }
 0x147   :  { %351 = dma.done.wait [#allocation3], 64  }
 0x148   :  { %352 = vsyncadd [#allocation3], 4294967232 }
 0x149   :  { %311 = vsyncpa [#allocation3], 1 }

</bundles_post_ra>
